<compile_context>
chip_gen: v7x
topology: tpu7x:2x2x1
jax: 0.10.0
libtpu: 0.0.40
codegen_flags: <defaults>
</compile_context>

<pallas_src>
import math

import jax
import jax.numpy as jnp
from jax.experimental import pallas as pl
from jax.experimental.pallas import tpu as pltpu

# ----------------------------- small, self-consistent config -----------------------------
BATCH = 2
SEQ = 8
HIDDEN = 32          # stands in for roberta hidden_size (768 in real CodeBERT)
N_HEADS = 4
HEAD_DIM = HIDDEN // N_HEADS
INTERMEDIATE = 64    # stands in for 3072
N_LAYERS = 2         # stands in for 12
VOCAB = 128
MAX_POS = 16
NUM_CLASSES1 = 2
NUM_CLASSES2 = 2
PAD_IDX = 1          # roberta padding_idx
LN_EPS = 1e-5
HEAD_OUT = 128       # lane-padded width of the fused classifier output
QKV_LANE = 128       # per-projection lane stride -> Q/K/V slices start 128-aligned
QKV_PAD = 3 * QKV_LANE

# rows of the packed per-layer "small tensor" block (one DMA per layer instead of eight)
ROW_BQKV, ROW_BO, ROW_LN1G, ROW_LN1B, ROW_BI, ROW_BF, ROW_LN2G, ROW_LN2B = range(8)
SMALL_ROWS = 8


def _layernorm(x, gamma, beta):
    mean = jnp.mean(x, axis=-1, keepdims=True)
    var = jnp.mean(jnp.square(x - mean), axis=-1, keepdims=True)
    inv = jax.lax.rsqrt(var + LN_EPS)
    return (x - mean) * inv * gamma + beta


# ----------------------------------- fused Pallas kernel ---------------------------------
def fused_model_kernel(emb_ref, bias_ref, embg_ref, embb_ref,
                       wqkv_ref, wo_ref, wi_ref, wf_ref, small_ref,
                       poolw_ref, poolb_ref, clsw_ref, clsb_ref,
                       logits_ref,
                       act_ref):
    layer = pl.program_id(1)

    # ---- first layer step (per batch element): embedding LayerNorm into resident scratch ----
    @pl.when(layer == 0)
    def _():
        act_ref[...] = _layernorm(emb_ref[...], embg_ref[...], embb_ref[...])

    h = act_ref[...]                                   # (S, H) f32, resident across layer axis
    small = small_ref[...]                             # (8, QKV_PAD) f32 packed biases/LN params

    # ---- fused QKV projection (output lane-padded: Q @ 0, K @ 128, V @ 256) ----
    # 1/sqrt(HEAD_DIM) is pre-folded into the Q columns of wqkv at init -> no score scaling.
    qkv = jnp.dot(h.astype(jnp.bfloat16), wqkv_ref[...],
                  preferred_element_type=jnp.float32) + small[ROW_BQKV:ROW_BQKV + 1, :]

    def split_heads(base):
        # TODO(synk): at real head_dim (64, 128-aligned) these become free lane views or a grid
        #             axis; at toy HEAD_DIM=8 this is a one-off single-vreg shuffle per layer.
        return jnp.stack(
            [qkv[:, base + hd * HEAD_DIM: base + (hd + 1) * HEAD_DIM] for hd in range(N_HEADS)],
            axis=0).astype(jnp.bfloat16)               # (N, S, D)

    q = split_heads(0)
    k = split_heads(QKV_LANE)
    v = split_heads(2 * QKV_LANE)

    # ---- attention: ONE head-batched contraction pair (no per-head matmul loop) ----
    s = jnp.einsum('nqd,nkd->nqk', q, k, preferred_element_type=jnp.float32)   # (N, S, S)
    s = s + bias_ref[...]                              # (1, S) additive mask, broadcast once
    m = jnp.max(s, axis=-1, keepdims=True)
    p = jnp.exp(s - m)
    p = p / jnp.sum(p, axis=-1, keepdims=True)         # exact softmax (parity with torch)
    ctx = jnp.einsum('nqk,nkd->nqd', p.astype(jnp.bfloat16), v,
                     preferred_element_type=jnp.float32)                        # (N, S, D)
    ctx = jnp.concatenate([ctx[hd] for hd in range(N_HEADS)], axis=-1)          # (S, H)

    attn_out = (jnp.dot(ctx.astype(jnp.bfloat16), wo_ref[...],
                        preferred_element_type=jnp.float32)
                + small[ROW_BO:ROW_BO + 1, 0:HIDDEN])
    h1 = _layernorm(h + attn_out,
                    small[ROW_LN1G:ROW_LN1G + 1, 0:HIDDEN],
                    small[ROW_LN1B:ROW_LN1B + 1, 0:HIDDEN])

    # ---- feed forward ----
    inter = (jnp.dot(h1.astype(jnp.bfloat16), wi_ref[...],
                     preferred_element_type=jnp.float32)
             + small[ROW_BI:ROW_BI + 1, 0:INTERMEDIATE])
    # TODO(synk): HF RoBERTa uses exact (erf) GELU; tanh approximation kept for robust lowering.
    inter = jax.nn.gelu(inter, approximate=True)
    ffn = (jnp.dot(inter.astype(jnp.bfloat16), wf_ref[...],
                   preferred_element_type=jnp.float32)
           + small[ROW_BF:ROW_BF + 1, 0:HIDDEN])
    h2 = _layernorm(h1 + ffn,
                    small[ROW_LN2G:ROW_LN2G + 1, 0:HIDDEN],
                    small[ROW_LN2B:ROW_LN2B + 1, 0:HIDDEN])
    act_ref[...] = h2                                   # stays resident in VMEM

    # ---- last layer step: RoBERTa pooler + both classifier heads (lane-dense padded out) ----
    @pl.when(layer == pl.num_programs(1) - 1)
    def _():
        cls_tok = h2[0:1, :]                            # <s> token, (1, H)
        pooled = jnp.tanh(jnp.dot(cls_tok.astype(jnp.bfloat16), poolw_ref[...],
                                  preferred_element_type=jnp.float32) + poolb_ref[...])
        logits_ref[...] = jnp.dot(pooled.astype(jnp.bfloat16), clsw_ref[...],
                                  preferred_element_type=jnp.float32) + clsb_ref[...]


# ---------------------------------- pallas_call wrapper ----------------------------------
def _vmem_limit_bytes(default=32 * 1024 * 1024):
    # Generation-aware VMEM budget: 32 MiB is plenty for the toy on every generation; when
    # scaling to real CodeBERT shapes raise toward ~100 MiB on v5e/v6e (128 MiB physical) and
    # cap near ~48-56 MiB on v7x (64 MiB physical).
    try:
        cap = getattr(pltpu.get_tpu_info(), "vmem_capacity_bytes", None)
        if cap:
            return int(min(default, cap // 2))
    except Exception:
        pass
    return default


def multitask_forward(params, input_ids, attention_mask):
    emb = embed(params, input_ids, attention_mask)                      # (B, S, H) f32 (glue)
    # layer-invariant additive attention bias, pre-shaped (B, 1, S) in the wrapper so the
    # kernel never reshapes/broadcasts HBM-sourced inputs
    attn_bias = ((1.0 - attention_mask.astype(jnp.float32)) * (-1e9))[:, None, :]

    args = (emb, attn_bias,
            params['emb_ln_g'], params['emb_ln_b'],
            params['wqkv'], params['wo'], params['wi'], params['wf'], params['small'],
            params['pool_w'], params['pool_b'], params['cls_w'], params['cls_b'])

    grid_spec = pltpu.PrefetchScalarGridSpec(
        num_scalar_prefetch=0,
        grid=(BATCH, N_LAYERS),     # batch: parallel (v7x 2nd TC); layer: sequential carry
        in_specs=[
            # per-batch activations / mask
            pl.BlockSpec((None, SEQ, HIDDEN), lambda b, l: (b, 0, 0)),           # emb
            pl.BlockSpec((None, 1, SEQ), lambda b, l: (b, 0, 0)),                # attn bias
            # layer-invariant params: block index constant -> fetched once, kept resident
            pl.BlockSpec((1, HIDDEN), lambda b, l: (0, 0)),                      # emb LN gamma
            pl.BlockSpec((1, HIDDEN), lambda b, l: (0, 0)),                      # emb LN beta
            # stacked per-layer weights: streamed (double-buffered) one layer per step
            pl.BlockSpec((None, HIDDEN, QKV_PAD), lambda b, l: (l, 0, 0)),       # wqkv (padded)
            pl.BlockSpec((None, HIDDEN, HIDDEN), lambda b, l: (l, 0, 0)),        # wo
            pl.BlockSpec((None, HIDDEN, INTERMEDIATE), lambda b, l: (l, 0, 0)),  # wi
            pl.BlockSpec((None, INTERMEDIATE, HIDDEN), lambda b, l: (l, 0, 0)),  # wf
            pl.BlockSpec((None, SMALL_ROWS, QKV_PAD), lambda b, l: (l, 0, 0)),   # packed smalls
            # head weights: constant index, used only on the last layer step
            pl.BlockSpec((HIDDEN, HIDDEN), lambda b, l: (0, 0)),                 # pooler W
            pl.BlockSpec((1, HIDDEN), lambda b, l: (0, 0)),                      # pooler b
            pl.BlockSpec((HIDDEN, HEAD_OUT), lambda b, l: (0, 0)),               # fused cls W
            pl.BlockSpec((1, HEAD_OUT), lambda b, l: (0, 0)),                    # fused cls b
        ],
        out_specs=pl.BlockSpec((None, 1, HEAD_OUT), lambda b, l: (b, 0, 0)),
        scratch_shapes=[pltpu.VMEM((SEQ, HIDDEN), jnp.float32)],   # per-batch resident activation
    )

    logits_pad = pl.pallas_call(
        fused_model_kernel,
        out_shape=jax.ShapeDtypeStruct((BATCH, 1, HEAD_OUT), jnp.float32),
        grid_spec=grid_spec,
        compiler_params=pltpu.CompilerParams(
            dimension_semantics=("parallel", "arbitrary"),
            vmem_limit_bytes=_vmem_limit_bytes(),
        ),
    )(*args)

    logits_pad = logits_pad[:, 0, :]
    logits1 = logits_pad[:, :NUM_CLASSES1]
    logits2 = logits_pad[:, NUM_CLASSES1:NUM_CLASSES1 + NUM_CLASSES2]
    return logits1, logits2


# ------------------------------------- parameters ----------------------------------------
def init_params(key):
    def nrm(k, shape, scale=0.02):
        return scale * jax.random.normal(k, shape, dtype=jnp.float32)

    keys = iter(jax.random.split(key, 32))
    bf16 = jnp.bfloat16

    word_emb = nrm(next(keys), (VOCAB, HIDDEN)).at[PAD_IDX].set(0.0)   # zero padding row (HF)
    pos_emb = nrm(next(keys), (MAX_POS, HIDDEN)).at[PAD_IDX].set(0.0)  # zero padding_idx row
    type_emb = nrm(next(keys), (1, HIDDEN))

    # Fused QKV weight, lane-padded so Q/K/V slices start at 128-lane boundaries.  The attention
    # scale 1/sqrt(HEAD_DIM) is folded into the Q columns (fold it into the Q bias too if loading
    # real, nonzero biases) so the kernel never scales the SxS score tensor.
    scale = 1.0 / math.sqrt(HEAD_DIM)
    wq = nrm(next(keys), (N_LAYERS, HIDDEN, HIDDEN)) * scale
    wk = nrm(next(keys), (N_LAYERS, HIDDEN, HIDDEN))
    wv = nrm(next(keys), (N_LAYERS, HIDDEN, HIDDEN))
    wqkv = jnp.zeros((N_LAYERS, HIDDEN, QKV_PAD), jnp.float32)
    wqkv = wqkv.at[:, :, 0:HIDDEN].set(wq)
    wqkv = wqkv.at[:, :, QKV_LANE:QKV_LANE + HIDDEN].set(wk)
    wqkv = wqkv.at[:, :, 2 * QKV_LANE:2 * QKV_LANE + HIDDEN].set(wv)

    # 8 tiny per-layer tensors packed into a single (N_LAYERS, 8, QKV_PAD) f32 block:
    # one DMA per layer step instead of eight, rows fill the 8 sublanes.
    small = jnp.zeros((N_LAYERS, SMALL_ROWS, QKV_PAD), jnp.float32)
    small = small.at[:, ROW_LN1G, 0:HIDDEN].set(1.0)     # LN1 gamma
    small = small.at[:, ROW_LN2G, 0:HIDDEN].set(1.0)     # LN2 gamma
    # bqkv / bo / bi / bf biases and LN betas stay zero

    cls1_w = nrm(next(keys), (HIDDEN, NUM_CLASSES1))
    cls2_w = nrm(next(keys), (HIDDEN, NUM_CLASSES2))
    cls_w = jnp.zeros((HIDDEN, HEAD_OUT), jnp.float32)
    cls_w = cls_w.at[:, :NUM_CLASSES1].set(cls1_w)
    cls_w = cls_w.at[:, NUM_CLASSES1:NUM_CLASSES1 + NUM_CLASSES2].set(cls2_w)

    return {
        'word_emb': word_emb,
        'pos_emb':  pos_emb,
        'type_emb': type_emb,
        'emb_ln_g': jnp.ones((1, HIDDEN), jnp.float32),
        'emb_ln_b': jnp.zeros((1, HIDDEN), jnp.float32),
        # stacked per-layer weights (bf16 for the MXU / halved HBM weight traffic)
        'wqkv':  wqkv.astype(bf16),
        'wo':    nrm(next(keys), (N_LAYERS, HIDDEN, HIDDEN)).astype(bf16),
        'wi':    nrm(next(keys), (N_LAYERS, HIDDEN, INTERMEDIATE)).astype(bf16),
        'wf':    nrm(next(keys), (N_LAYERS, INTERMEDIATE, HIDDEN)).astype(bf16),
        'small': small,
        # pooler + fused (lane-padded) classifier heads
        'pool_w': nrm(next(keys), (HIDDEN, HIDDEN)).astype(bf16),
        'pool_b': jnp.zeros((1, HIDDEN), jnp.float32),
        'cls_w':  cls_w.astype(bf16),
        'cls_b':  jnp.zeros((1, HEAD_OUT), jnp.float32),
    }


# --------------------------------------- glue --------------------------------------------
def embed(params, input_ids, attention_mask):
    del attention_mask  # HF RoBERTa derives position ids from input_ids != padding_idx
    word = params['word_emb'][input_ids]                                     # (B,S,H)
    pmask = (input_ids != PAD_IDX).astype(jnp.int32)
    pos_ids = jnp.cumsum(pmask, axis=1) * pmask + PAD_IDX                    # HF create_position_ids
    pos = params['pos_emb'][pos_ids]                                         # (B,S,H)
    tok = params['type_emb'][jnp.zeros_like(input_ids)]                      # (B,S,H)
    return (word + pos + tok).astype(jnp.float32)


# ----------------------------------------- main ------------------------------------------
if __name__ == "__main__":
    key = jax.random.PRNGKey(0)
    k_param, k_ids = jax.random.split(key)

    params = init_params(k_param)
    input_ids = jax.random.randint(k_ids, (BATCH, SEQ), 2, VOCAB, dtype=jnp.int32)
    attention_mask = jnp.ones((BATCH, SEQ), dtype=jnp.int32)

    logits1, logits2 = jax.jit(multitask_forward)(params, input_ids, attention_mask)
    jax.block_until_ready((logits1, logits2))

    assert logits1.shape == (BATCH, NUM_CLASSES1)
    assert logits2.shape == (BATCH, NUM_CLASSES2)
    print("KERNEL_OK")
</pallas_src>

<mosaic_0001>
module attributes {stable_mosaic.version = 11 : i64} {
  func.func @fused_model_kernel(%arg0: i32, %arg1: i32, %arg2: memref<1x8x32xf32, #tpu.memory_space<vmem>>, %arg3: memref<1x1x8xf32, #tpu.memory_space<vmem>>, %arg4: memref<1x32xf32, #tpu.memory_space<vmem>>, %arg5: memref<1x32xf32, #tpu.memory_space<vmem>>, %arg6: memref<1x32x384xbf16, #tpu.memory_space<vmem>>, %arg7: memref<1x32x32xbf16, #tpu.memory_space<vmem>>, %arg8: memref<1x32x64xbf16, #tpu.memory_space<vmem>>, %arg9: memref<1x64x32xbf16, #tpu.memory_space<vmem>>, %arg10: memref<1x8x384xf32, #tpu.memory_space<vmem>>, %arg11: memref<32x32xbf16, #tpu.memory_space<vmem>>, %arg12: memref<1x32xf32, #tpu.memory_space<vmem>>, %arg13: memref<32x128xbf16, #tpu.memory_space<vmem>>, %arg14: memref<1x128xf32, #tpu.memory_space<vmem>>, %arg15: memref<1x1x128xf32, #tpu.memory_space<vmem>>, %arg16: memref<8x32xf32, #tpu.memory_space<vmem>>) attributes {dimension_semantics = [#tpu.dimension_semantics<parallel>, #tpu.dimension_semantics<arbitrary>], iteration_bounds = array<i64: 2, 2>, scalar_prefetch = 0 : i64, scratch_operands = 1 : i64, tpu.core_type = #tpu.core_type<tc>, window_params = [{transform_indices = @transform_0, window_bounds = array<i64: 1, 8, 32>}, {transform_indices = @transform_1, window_bounds = array<i64: 1, 1, 8>}, {pipeline_mode = #tpu.pipeline_mode<synchronous>, transform_indices = @transform_2, window_bounds = array<i64: 1, 32>}, {pipeline_mode = #tpu.pipeline_mode<synchronous>, transform_indices = @transform_3, window_bounds = array<i64: 1, 32>}, {transform_indices = @transform_4, window_bounds = array<i64: 1, 32, 384>}, {transform_indices = @transform_5, window_bounds = array<i64: 1, 32, 32>}, {transform_indices = @transform_6, window_bounds = array<i64: 1, 32, 64>}, {transform_indices = @transform_7, window_bounds = array<i64: 1, 64, 32>}, {transform_indices = @transform_8, window_bounds = array<i64: 1, 8, 384>}, {pipeline_mode = #tpu.pipeline_mode<synchronous>, transform_indices = @transform_9, window_bounds = array<i64: 32, 32>}, {pipeline_mode = #tpu.pipeline_mode<synchronous>, transform_indices = @transform_10, window_bounds = array<i64: 1, 32>}, {pipeline_mode = #tpu.pipeline_mode<synchronous>, transform_indices = @transform_11, window_bounds = array<i64: 32, 128>}, {pipeline_mode = #tpu.pipeline_mode<synchronous>, transform_indices = @transform_12, window_bounds = array<i64: 1, 128>}, {transform_indices = @transform_13, window_bounds = array<i64: 1, 1, 128>}]} {
    %c0_i32 = arith.constant 0 : i32
    %0 = arith.cmpi eq, %arg1, %c0_i32 : i32
    %1 = arith.extui %0 : i1 to i32
    %c0_i32_0 = arith.constant 0 : i32
    %2 = arith.cmpi ne, %1, %c0_i32_0 : i32
    scf.if %2 {
      %c0_44 = arith.constant 0 : index
      %c0_45 = arith.constant 0 : index
      %c0_46 = arith.constant 0 : index
      %157 = vector.load %arg2[%c0_44, %c0_45, %c0_46] : memref<1x8x32xf32, #tpu.memory_space<vmem>>, vector<1x8x32xf32>
      %158 = vector.shape_cast %157 : vector<1x8x32xf32> to vector<8x32xf32>
      %c0_47 = arith.constant 0 : index
      %c0_48 = arith.constant 0 : index
      %159 = vector.load %arg4[%c0_47, %c0_48] : memref<1x32xf32, #tpu.memory_space<vmem>>, vector<1x32xf32>
      %c0_49 = arith.constant 0 : index
      %c0_50 = arith.constant 0 : index
      %160 = vector.load %arg5[%c0_49, %c0_50] : memref<1x32xf32, #tpu.memory_space<vmem>>, vector<1x32xf32>
      %cst_51 = arith.constant dense<0.000000e+00> : vector<8xf32>
      %161 = vector.multi_reduction <add>, %158, %cst_51 [1] : vector<8x32xf32> to vector<8xf32>
      %162 = vector.shape_cast %161 : vector<8xf32> to vector<8x1xf32>
      %cst_52 = arith.constant 3.200000e+01 : f32
      %163 = vector.broadcast %cst_52 : f32 to vector<8x1xf32>
      %164 = arith.divf %162, %163 : vector<8x1xf32>
      %165 = vector.broadcast %164 : vector<8x1xf32> to vector<8x32xf32>
      %166 = arith.subf %158, %165 : vector<8x32xf32>
      %167 = arith.mulf %166, %166 : vector<8x32xf32>
      %cst_53 = arith.constant dense<0.000000e+00> : vector<8xf32>
      %168 = vector.multi_reduction <add>, %167, %cst_53 [1] : vector<8x32xf32> to vector<8xf32>
      %169 = vector.shape_cast %168 : vector<8xf32> to vector<8x1xf32>
      %cst_54 = arith.constant 3.200000e+01 : f32
      %170 = vector.broadcast %cst_54 : f32 to vector<8x1xf32>
      %171 = arith.divf %169, %170 : vector<8x1xf32>
      %cst_55 = arith.constant 9.99999974E-6 : f32
      %172 = vector.broadcast %cst_55 : f32 to vector<8x1xf32>
      %173 = arith.addf %171, %172 : vector<8x1xf32>
      %174 = math.rsqrt %173 : vector<8x1xf32>
      %175 = vector.broadcast %164 : vector<8x1xf32> to vector<8x32xf32>
      %176 = arith.subf %158, %175 : vector<8x32xf32>
      %177 = vector.broadcast %174 : vector<8x1xf32> to vector<8x32xf32>
      %178 = arith.mulf %176, %177 : vector<8x32xf32>
      %179 = vector.broadcast %159 : vector<1x32xf32> to vector<8x32xf32>
      %180 = arith.mulf %178, %179 : vector<8x32xf32>
      %181 = vector.broadcast %160 : vector<1x32xf32> to vector<8x32xf32>
      %182 = arith.addf %180, %181 : vector<8x32xf32>
      %c0_56 = arith.constant 0 : index
      %c0_57 = arith.constant 0 : index
      %183 = vector.load %arg16[%c0_56, %c0_57] : memref<8x32xf32, #tpu.memory_space<vmem>>, vector<8x32xf32>
      tpu.vector_store %arg16[%c0_56, %c0_57], %182 {strides = array<i32>} : memref<8x32xf32, #tpu.memory_space<vmem>>, vector<8x32xf32>,
    } else {
    }
    %c0 = arith.constant 0 : index
    %c0_1 = arith.constant 0 : index
    %3 = vector.load %arg16[%c0, %c0_1] : memref<8x32xf32, #tpu.memory_space<vmem>>, vector<8x32xf32>
    %c0_2 = arith.constant 0 : index
    %c0_3 = arith.constant 0 : index
    %c0_4 = arith.constant 0 : index
    %4 = vector.load %arg10[%c0_2, %c0_3, %c0_4] : memref<1x8x384xf32, #tpu.memory_space<vmem>>, vector<1x8x384xf32>
    %5 = vector.shape_cast %4 : vector<1x8x384xf32> to vector<8x384xf32>
    %6 = arith.truncf %3 : vector<8x32xf32> to vector<8x32xbf16>
    %c0_5 = arith.constant 0 : index
    %c0_6 = arith.constant 0 : index
    %c0_7 = arith.constant 0 : index
    %7 = vector.load %arg6[%c0_5, %c0_6, %c0_7] : memref<1x32x384xbf16, #tpu.memory_space<vmem>>, vector<1x32x384xbf16>
    %8 = vector.shape_cast %7 : vector<1x32x384xbf16> to vector<32x384xbf16>
    %cst = arith.constant dense<0.000000e+00> : vector<8x384xf32>
    %9 = tpu.matmul %6, %8, %cst {dimension_numbers = #tpu.dot_dimension_numbers<[1], [0], [0], [1], [0, 0, 1, 1], [], []>} : vector<8x32xbf16>, vector<32x384xbf16>, vector<8x384xf32> -> vector<8x384xf32>
    %10 = vector.extract_strided_slice %5 {offsets = [0, 0], sizes = [1, 384], strides = [1, 1]} : vector<8x384xf32> to vector<1x384xf32>
    %11 = vector.broadcast %10 : vector<1x384xf32> to vector<8x384xf32>
    %12 = arith.addf %9, %11 : vector<8x384xf32>
    %13 = vector.extract_strided_slice %12 {offsets = [0, 0], sizes = [8, 8], strides = [1, 1]} : vector<8x384xf32> to vector<8x8xf32>
    %14 = vector.extract_strided_slice %12 {offsets = [0, 8], sizes = [8, 8], strides = [1, 1]} : vector<8x384xf32> to vector<8x8xf32>
    %15 = vector.extract_strided_slice %12 {offsets = [0, 16], sizes = [8, 8], strides = [1, 1]} : vector<8x384xf32> to vector<8x8xf32>
    %16 = vector.extract_strided_slice %12 {offsets = [0, 24], sizes = [8, 8], strides = [1, 1]} : vector<8x384xf32> to vector<8x8xf32>
    %17 = vector.shape_cast %13 : vector<8x8xf32> to vector<1x8x8xf32>
    %18 = vector.shape_cast %14 : vector<8x8xf32> to vector<1x8x8xf32>
    %19 = vector.shape_cast %15 : vector<8x8xf32> to vector<1x8x8xf32>
    %20 = vector.shape_cast %16 : vector<8x8xf32> to vector<1x8x8xf32>
    %21 = tpu.concatenate %17, %18, %19, %20 in 0 : vector<1x8x8xf32>, vector<1x8x8xf32>, vector<1x8x8xf32>, vector<1x8x8xf32> -> vector<4x8x8xf32>
    %22 = arith.truncf %21 : vector<4x8x8xf32> to vector<4x8x8xbf16>
    %23 = vector.extract_strided_slice %12 {offsets = [0, 128], sizes = [8, 8], strides = [1, 1]} : vector<8x384xf32> to vector<8x8xf32>
    %24 = vector.extract_strided_slice %12 {offsets = [0, 136], sizes = [8, 8], strides = [1, 1]} : vector<8x384xf32> to vector<8x8xf32>
    %25 = vector.extract_strided_slice %12 {offsets = [0, 144], sizes = [8, 8], strides = [1, 1]} : vector<8x384xf32> to vector<8x8xf32>
    %26 = vector.extract_strided_slice %12 {offsets = [0, 152], sizes = [8, 8], strides = [1, 1]} : vector<8x384xf32> to vector<8x8xf32>
    %27 = vector.shape_cast %23 : vector<8x8xf32> to vector<1x8x8xf32>
    %28 = vector.shape_cast %24 : vector<8x8xf32> to vector<1x8x8xf32>
    %29 = vector.shape_cast %25 : vector<8x8xf32> to vector<1x8x8xf32>
    %30 = vector.shape_cast %26 : vector<8x8xf32> to vector<1x8x8xf32>
    %31 = tpu.concatenate %27, %28, %29, %30 in 0 : vector<1x8x8xf32>, vector<1x8x8xf32>, vector<1x8x8xf32>, vector<1x8x8xf32> -> vector<4x8x8xf32>
    %32 = arith.truncf %31 : vector<4x8x8xf32> to vector<4x8x8xbf16>
    %33 = vector.extract_strided_slice %12 {offsets = [0, 256], sizes = [8, 8], strides = [1, 1]} : vector<8x384xf32> to vector<8x8xf32>
    %34 = vector.extract_strided_slice %12 {offsets = [0, 264], sizes = [8, 8], strides = [1, 1]} : vector<8x384xf32> to vector<8x8xf32>
    %35 = vector.extract_strided_slice %12 {offsets = [0, 272], sizes = [8, 8], strides = [1, 1]} : vector<8x384xf32> to vector<8x8xf32>
    %36 = vector.extract_strided_slice %12 {offsets = [0, 280], sizes = [8, 8], strides = [1, 1]} : vector<8x384xf32> to vector<8x8xf32>
    %37 = vector.shape_cast %33 : vector<8x8xf32> to vector<1x8x8xf32>
    %38 = vector.shape_cast %34 : vector<8x8xf32> to vector<1x8x8xf32>
    %39 = vector.shape_cast %35 : vector<8x8xf32> to vector<1x8x8xf32>
    %40 = vector.shape_cast %36 : vector<8x8xf32> to vector<1x8x8xf32>
    %41 = tpu.concatenate %37, %38, %39, %40 in 0 : vector<1x8x8xf32>, vector<1x8x8xf32>, vector<1x8x8xf32>, vector<1x8x8xf32> -> vector<4x8x8xf32>
    %42 = arith.truncf %41 : vector<4x8x8xf32> to vector<4x8x8xbf16>
    "tpu.trace_start"() <{level = 10 : i32, message = "nqd,nkd->nqk"}> : () -> ()
    %cst_8 = arith.constant dense<0.000000e+00> : vector<4x8x8xf32>
    %43 = tpu.matmul %22, %32, %cst_8 {dimension_numbers = #tpu.dot_dimension_numbers<[2], [2], [1], [1], [0, 0, 0, 1, 1, 1], [0], [0]>} : vector<4x8x8xbf16>, vector<4x8x8xbf16>, vector<4x8x8xf32> -> vector<4x8x8xf32>
    "tpu.trace_stop"() : () -> ()
    %c0_9 = arith.constant 0 : index
    %c0_10 = arith.constant 0 : index
    %c0_11 = arith.constant 0 : index
    %44 = vector.load %arg3[%c0_9, %c0_10, %c0_11] : memref<1x1x8xf32, #tpu.memory_space<vmem>>, vector<1x1x8xf32>
    %45 = vector.shape_cast %44 : vector<1x1x8xf32> to vector<1x8xf32>
    %46 = vector.shape_cast %45 : vector<1x8xf32> to vector<1x1x8xf32>
    %47 = vector.broadcast %46 : vector<1x1x8xf32> to vector<4x8x8xf32>
    %48 = arith.addf %43, %47 : vector<4x8x8xf32>
    %cst_12 = arith.constant dense<0xFF800000> : vector<4x8xf32>
    %49 = vector.multi_reduction <maximumf>, %48, %cst_12 [2] : vector<4x8x8xf32> to vector<4x8xf32>
    %50 = vector.shape_cast %49 : vector<4x8xf32> to vector<4x8x1xf32>
    %51 = vector.broadcast %50 : vector<4x8x1xf32> to vector<4x8x8xf32>
    %52 = arith.subf %48, %51 : vector<4x8x8xf32>
    %53 = math.exp %52 : vector<4x8x8xf32>
    %cst_13 = arith.constant dense<0.000000e+00> : vector<4x8xf32>
    %54 = vector.multi_reduction <add>, %53, %cst_13 [2] : vector<4x8x8xf32> to vector<4x8xf32>
    %55 = vector.shape_cast %54 : vector<4x8xf32> to vector<4x8x1xf32>
    %56 = vector.broadcast %55 : vector<4x8x1xf32> to vector<4x8x8xf32>
    %57 = arith.divf %53, %56 : vector<4x8x8xf32>
    %58 = arith.truncf %57 : vector<4x8x8xf32> to vector<4x8x8xbf16>
    "tpu.trace_start"() <{level = 10 : i32, message = "nqk,nkd->nqd"}> : () -> ()
    %cst_14 = arith.constant dense<0.000000e+00> : vector<4x8x8xf32>
    %59 = tpu.matmul %58, %42, %cst_14 {dimension_numbers = #tpu.dot_dimension_numbers<[2], [1], [1], [2], [0, 0, 0, 1, 1, 2], [0], [0]>} : vector<4x8x8xbf16>, vector<4x8x8xbf16>, vector<4x8x8xf32> -> vector<4x8x8xf32>
    "tpu.trace_stop"() : () -> ()
    %60 = vector.extract_strided_slice %59 {offsets = [0, 0, 0], sizes = [1, 8, 8], strides = [1, 1, 1]} : vector<4x8x8xf32> to vector<1x8x8xf32>
    %61 = vector.shape_cast %60 : vector<1x8x8xf32> to vector<8x8xf32>
    %62 = vector.extract_strided_slice %59 {offsets = [1, 0, 0], sizes = [1, 8, 8], strides = [1, 1, 1]} : vector<4x8x8xf32> to vector<1x8x8xf32>
    %63 = vector.shape_cast %62 : vector<1x8x8xf32> to vector<8x8xf32>
    %64 = vector.extract_strided_slice %59 {offsets = [2, 0, 0], sizes = [1, 8, 8], strides = [1, 1, 1]} : vector<4x8x8xf32> to vector<1x8x8xf32>
    %65 = vector.shape_cast %64 : vector<1x8x8xf32> to vector<8x8xf32>
    %66 = vector.extract_strided_slice %59 {offsets = [3, 0, 0], sizes = [1, 8, 8], strides = [1, 1, 1]} : vector<4x8x8xf32> to vector<1x8x8xf32>
    %67 = vector.shape_cast %66 : vector<1x8x8xf32> to vector<8x8xf32>
    %68 = tpu.concatenate %61, %63, %65, %67 in 1 : vector<8x8xf32>, vector<8x8xf32>, vector<8x8xf32>, vector<8x8xf32> -> vector<8x32xf32>
    %69 = arith.truncf %68 : vector<8x32xf32> to vector<8x32xbf16>
    %c0_15 = arith.constant 0 : index
    %c0_16 = arith.constant 0 : index
    %c0_17 = arith.constant 0 : index
    %70 = vector.load %arg7[%c0_15, %c0_16, %c0_17] : memref<1x32x32xbf16, #tpu.memory_space<vmem>>, vector<1x32x32xbf16>
    %71 = vector.shape_cast %70 : vector<1x32x32xbf16> to vector<32x32xbf16>
    %cst_18 = arith.constant dense<0.000000e+00> : vector<8x32xf32>
    %72 = tpu.matmul %69, %71, %cst_18 {dimension_numbers = #tpu.dot_dimension_numbers<[1], [0], [0], [1], [0, 0, 1, 1], [], []>} : vector<8x32xbf16>, vector<32x32xbf16>, vector<8x32xf32> -> vector<8x32xf32>
    %73 = vector.extract_strided_slice %5 {offsets = [1, 0], sizes = [1, 32], strides = [1, 1]} : vector<8x384xf32> to vector<1x32xf32>
    %74 = vector.broadcast %73 : vector<1x32xf32> to vector<8x32xf32>
    %75 = arith.addf %72, %74 : vector<8x32xf32>
    %76 = arith.addf %3, %75 : vector<8x32xf32>
    %77 = vector.extract_strided_slice %5 {offsets = [2, 0], sizes = [1, 32], strides = [1, 1]} : vector<8x384xf32> to vector<1x32xf32>
    %78 = vector.extract_strided_slice %5 {offsets = [3, 0], sizes = [1, 32], strides = [1, 1]} : vector<8x384xf32> to vector<1x32xf32>
    %cst_19 = arith.constant dense<0.000000e+00> : vector<8xf32>
    %79 = vector.multi_reduction <add>, %76, %cst_19 [1] : vector<8x32xf32> to vector<8xf32>
    %80 = vector.shape_cast %79 : vector<8xf32> to vector<8x1xf32>
    %cst_20 = arith.constant 3.200000e+01 : f32
    %81 = vector.broadcast %cst_20 : f32 to vector<8x1xf32>
    %82 = arith.divf %80, %81 : vector<8x1xf32>
    %83 = vector.broadcast %82 : vector<8x1xf32> to vector<8x32xf32>
    %84 = arith.subf %76, %83 : vector<8x32xf32>
    %85 = arith.mulf %84, %84 : vector<8x32xf32>
    %cst_21 = arith.constant dense<0.000000e+00> : vector<8xf32>
    %86 = vector.multi_reduction <add>, %85, %cst_21 [1] : vector<8x32xf32> to vector<8xf32>
    %87 = vector.shape_cast %86 : vector<8xf32> to vector<8x1xf32>
    %cst_22 = arith.constant 3.200000e+01 : f32
    %88 = vector.broadcast %cst_22 : f32 to vector<8x1xf32>
    %89 = arith.divf %87, %88 : vector<8x1xf32>
    %cst_23 = arith.constant 9.99999974E-6 : f32
    %90 = vector.broadcast %cst_23 : f32 to vector<8x1xf32>
    %91 = arith.addf %89, %90 : vector<8x1xf32>
    %92 = math.rsqrt %91 : vector<8x1xf32>
    %93 = vector.broadcast %82 : vector<8x1xf32> to vector<8x32xf32>
    %94 = arith.subf %76, %93 : vector<8x32xf32>
    %95 = vector.broadcast %92 : vector<8x1xf32> to vector<8x32xf32>
    %96 = arith.mulf %94, %95 : vector<8x32xf32>
    %97 = vector.broadcast %77 : vector<1x32xf32> to vector<8x32xf32>
    %98 = arith.mulf %96, %97 : vector<8x32xf32>
    %99 = vector.broadcast %78 : vector<1x32xf32> to vector<8x32xf32>
    %100 = arith.addf %98, %99 : vector<8x32xf32>
    %101 = arith.truncf %100 : vector<8x32xf32> to vector<8x32xbf16>
    %c0_24 = arith.constant 0 : index
    %c0_25 = arith.constant 0 : index
    %c0_26 = arith.constant 0 : index
    %102 = vector.load %arg8[%c0_24, %c0_25, %c0_26] : memref<1x32x64xbf16, #tpu.memory_space<vmem>>, vector<1x32x64xbf16>
    %103 = vector.shape_cast %102 : vector<1x32x64xbf16> to vector<32x64xbf16>
    %cst_27 = arith.constant dense<0.000000e+00> : vector<8x64xf32>
    %104 = tpu.matmul %101, %103, %cst_27 {dimension_numbers = #tpu.dot_dimension_numbers<[1], [0], [0], [1], [0, 0, 1, 1], [], []>} : vector<8x32xbf16>, vector<32x64xbf16>, vector<8x64xf32> -> vector<8x64xf32>
    %105 = vector.extract_strided_slice %5 {offsets = [4, 0], sizes = [1, 64], strides = [1, 1]} : vector<8x384xf32> to vector<1x64xf32>
    %106 = vector.broadcast %105 : vector<1x64xf32> to vector<8x64xf32>
    %107 = arith.addf %104, %106 : vector<8x64xf32>
    %108 = arith.mulf %107, %107 : vector<8x64xf32>
    %109 = arith.mulf %107, %108 : vector<8x64xf32>
    %cst_28 = arith.constant 4.471500e-02 : f32
    %110 = vector.broadcast %cst_28 : f32 to vector<8x64xf32>
    %111 = arith.mulf %110, %109 : vector<8x64xf32>
    %112 = arith.addf %107, %111 : vector<8x64xf32>
    %cst_29 = arith.constant 0.797884583 : f32
    %113 = vector.broadcast %cst_29 : f32 to vector<8x64xf32>
    %114 = arith.mulf %113, %112 : vector<8x64xf32>
    %115 = math.tanh %114 : vector<8x64xf32>
    %cst_30 = arith.constant 1.000000e+00 : f32
    %116 = vector.broadcast %cst_30 : f32 to vector<8x64xf32>
    %117 = arith.addf %116, %115 : vector<8x64xf32>
    %cst_31 = arith.constant 5.000000e-01 : f32
    %118 = vector.broadcast %cst_31 : f32 to vector<8x64xf32>
    %119 = arith.mulf %118, %117 : vector<8x64xf32>
    %120 = arith.mulf %107, %119 : vector<8x64xf32>
    %121 = arith.truncf %120 : vector<8x64xf32> to vector<8x64xbf16>
    %c0_32 = arith.constant 0 : index
    %c0_33 = arith.constant 0 : index
    %c0_34 = arith.constant 0 : index
    %122 = vector.load %arg9[%c0_32, %c0_33, %c0_34] : memref<1x64x32xbf16, #tpu.memory_space<vmem>>, vector<1x64x32xbf16>
    %123 = vector.shape_cast %122 : vector<1x64x32xbf16> to vector<64x32xbf16>
    %cst_35 = arith.constant dense<0.000000e+00> : vector<8x32xf32>
    %124 = tpu.matmul %121, %123, %cst_35 {dimension_numbers = #tpu.dot_dimension_numbers<[1], [0], [0], [1], [0, 0, 1, 1], [], []>} : vector<8x64xbf16>, vector<64x32xbf16>, vector<8x32xf32> -> vector<8x32xf32>
    %125 = vector.extract_strided_slice %5 {offsets = [5, 0], sizes = [1, 32], strides = [1, 1]} : vector<8x384xf32> to vector<1x32xf32>
    %126 = vector.broadcast %125 : vector<1x32xf32> to vector<8x32xf32>
    %127 = arith.addf %124, %126 : vector<8x32xf32>
    %128 = arith.addf %100, %127 : vector<8x32xf32>
    %129 = vector.extract_strided_slice %5 {offsets = [6, 0], sizes = [1, 32], strides = [1, 1]} : vector<8x384xf32> to vector<1x32xf32>
    %130 = vector.extract_strided_slice %5 {offsets = [7, 0], sizes = [1, 32], strides = [1, 1]} : vector<8x384xf32> to vector<1x32xf32>
    %cst_36 = arith.constant dense<0.000000e+00> : vector<8xf32>
    %131 = vector.multi_reduction <add>, %128, %cst_36 [1] : vector<8x32xf32> to vector<8xf32>
    %132 = vector.shape_cast %131 : vector<8xf32> to vector<8x1xf32>
    %cst_37 = arith.constant 3.200000e+01 : f32
    %133 = vector.broadcast %cst_37 : f32 to vector<8x1xf32>
    %134 = arith.divf %132, %133 : vector<8x1xf32>
    %135 = vector.broadcast %134 : vector<8x1xf32> to vector<8x32xf32>
    %136 = arith.subf %128, %135 : vector<8x32xf32>
    %137 = arith.mulf %136, %136 : vector<8x32xf32>
    %cst_38 = arith.constant dense<0.000000e+00> : vector<8xf32>
    %138 = vector.multi_reduction <add>, %137, %cst_38 [1] : vector<8x32xf32> to vector<8xf32>
    %139 = vector.shape_cast %138 : vector<8xf32> to vector<8x1xf32>
    %cst_39 = arith.constant 3.200000e+01 : f32
    %140 = vector.broadcast %cst_39 : f32 to vector<8x1xf32>
    %141 = arith.divf %139, %140 : vector<8x1xf32>
    %cst_40 = arith.constant 9.99999974E-6 : f32
    %142 = vector.broadcast %cst_40 : f32 to vector<8x1xf32>
    %143 = arith.addf %141, %142 : vector<8x1xf32>
    %144 = math.rsqrt %143 : vector<8x1xf32>
    %145 = vector.broadcast %134 : vector<8x1xf32> to vector<8x32xf32>
    %146 = arith.subf %128, %145 : vector<8x32xf32>
    %147 = vector.broadcast %144 : vector<8x1xf32> to vector<8x32xf32>
    %148 = arith.mulf %146, %147 : vector<8x32xf32>
    %149 = vector.broadcast %129 : vector<1x32xf32> to vector<8x32xf32>
    %150 = arith.mulf %148, %149 : vector<8x32xf32>
    %151 = vector.broadcast %130 : vector<1x32xf32> to vector<8x32xf32>
    %152 = arith.addf %150, %151 : vector<8x32xf32>
    %c0_41 = arith.constant 0 : index
    %c0_42 = arith.constant 0 : index
    %153 = vector.load %arg16[%c0_41, %c0_42] : memref<8x32xf32, #tpu.memory_space<vmem>>, vector<8x32xf32>
    tpu.vector_store %arg16[%c0_41, %c0_42], %152 {strides = array<i32>} : memref<8x32xf32, #tpu.memory_space<vmem>>, vector<8x32xf32>,
    %c1_i32 = arith.constant 1 : i32
    %154 = arith.cmpi eq, %arg1, %c1_i32 : i32
    %155 = arith.extui %154 : i1 to i32
    %c0_i32_43 = arith.constant 0 : i32
    %156 = arith.cmpi ne, %155, %c0_i32_43 : i32
    scf.if %156 {
      %157 = vector.extract_strided_slice %152 {offsets = [0, 0], sizes = [1, 32], strides = [1, 1]} : vector<8x32xf32> to vector<1x32xf32>
      %158 = arith.truncf %157 : vector<1x32xf32> to vector<1x32xbf16>
      %c0_44 = arith.constant 0 : index
      %c0_45 = arith.constant 0 : index
      %159 = vector.load %arg11[%c0_44, %c0_45] : memref<32x32xbf16, #tpu.memory_space<vmem>>, vector<32x32xbf16>
      %cst_46 = arith.constant dense<0.000000e+00> : vector<1x32xf32>
      %160 = tpu.matmul %158, %159, %cst_46 {dimension_numbers = #tpu.dot_dimension_numbers<[1], [0], [0], [1], [0, 0, 1, 1], [], []>} : vector<1x32xbf16>, vector<32x32xbf16>, vector<1x32xf32> -> vector<1x32xf32>
      %c0_47 = arith.constant 0 : index
      %c0_48 = arith.constant 0 : index
      %161 = vector.load %arg12[%c0_47, %c0_48] : memref<1x32xf32, #tpu.memory_space<vmem>>, vector<1x32xf32>
      %162 = arith.addf %160, %161 : vector<1x32xf32>
      %163 = math.tanh %162 : vector<1x32xf32>
      %164 = arith.truncf %163 : vector<1x32xf32> to vector<1x32xbf16>
      %c0_49 = arith.constant 0 : index
      %c0_50 = arith.constant 0 : index
      %165 = vector.load %arg13[%c0_49, %c0_50] : memref<32x128xbf16, #tpu.memory_space<vmem>>, vector<32x128xbf16>
      %cst_51 = arith.constant dense<0.000000e+00> : vector<1x128xf32>
      %166 = tpu.matmul %164, %165, %cst_51 {dimension_numbers = #tpu.dot_dimension_numbers<[1], [0], [0], [1], [0, 0, 1, 1], [], []>} : vector<1x32xbf16>, vector<32x128xbf16>, vector<1x128xf32> -> vector<1x128xf32>
      %c0_52 = arith.constant 0 : index
      %c0_53 = arith.constant 0 : index
      %167 = vector.load %arg14[%c0_52, %c0_53] : memref<1x128xf32, #tpu.memory_space<vmem>>, vector<1x128xf32>
      %168 = arith.addf %166, %167 : vector<1x128xf32>
      %c0_54 = arith.constant 0 : index
      %c0_55 = arith.constant 0 : index
      %c0_56 = arith.constant 0 : index
      %169 = vector.load %arg15[%c0_54, %c0_55, %c0_56] : memref<1x1x128xf32, #tpu.memory_space<vmem>>, vector<1x1x128xf32>
      %170 = vector.shape_cast %169 : vector<1x1x128xf32> to vector<1x128xf32>
      %171 = vector.shape_cast %168 : vector<1x128xf32> to vector<1x1x128xf32>
      tpu.vector_store %arg15[%c0_54, %c0_55, %c0_56], %171 {strides = array<i32>} : memref<1x1x128xf32, #tpu.memory_space<vmem>>, vector<1x1x128xf32>,
    } else {
    }
    return
  }
  func.func @transform_0(%arg0: i32, %arg1: i32) -> (i32, i32, i32) {
    %c0_i32 = arith.constant 0 : i32
    %c0_i32_0 = arith.constant 0 : i32
    %c0_i32_1 = arith.constant 0 : i32
    return %arg0, %c0_i32, %c0_i32_0 : i32, i32, i32
  }
  func.func @transform_1(%arg0: i32, %arg1: i32) -> (i32, i32, i32) {
    %c0_i32 = arith.constant 0 : i32
    %c0_i32_0 = arith.constant 0 : i32
    %c0_i32_1 = arith.constant 0 : i32
    return %arg0, %c0_i32, %c0_i32_0 : i32, i32, i32
  }
  func.func @transform_2(%arg0: i32, %arg1: i32) -> (i32, i32) {
    %c0_i32 = arith.constant 0 : i32
    %c0_i32_0 = arith.constant 0 : i32
    %c0_i32_1 = arith.constant 0 : i32
    return %c0_i32, %c0_i32_0 : i32, i32
  }
  func.func @transform_3(%arg0: i32, %arg1: i32) -> (i32, i32) {
    %c0_i32 = arith.constant 0 : i32
    %c0_i32_0 = arith.constant 0 : i32
    %c0_i32_1 = arith.constant 0 : i32
    return %c0_i32, %c0_i32_0 : i32, i32
  }
  func.func @transform_4(%arg0: i32, %arg1: i32) -> (i32, i32, i32) {
    %c0_i32 = arith.constant 0 : i32
    %c0_i32_0 = arith.constant 0 : i32
    %c0_i32_1 = arith.constant 0 : i32
    return %arg1, %c0_i32, %c0_i32_0 : i32, i32, i32
  }
  func.func @transform_5(%arg0: i32, %arg1: i32) -> (i32, i32, i32) {
    %c0_i32 = arith.constant 0 : i32
    %c0_i32_0 = arith.constant 0 : i32
    %c0_i32_1 = arith.constant 0 : i32
    return %arg1, %c0_i32, %c0_i32_0 : i32, i32, i32
  }
  func.func @transform_6(%arg0: i32, %arg1: i32) -> (i32, i32, i32) {
    %c0_i32 = arith.constant 0 : i32
    %c0_i32_0 = arith.constant 0 : i32
    %c0_i32_1 = arith.constant 0 : i32
    return %arg1, %c0_i32, %c0_i32_0 : i32, i32, i32
  }
  func.func @transform_7(%arg0: i32, %arg1: i32) -> (i32, i32, i32) {
    %c0_i32 = arith.constant 0 : i32
    %c0_i32_0 = arith.constant 0 : i32
    %c0_i32_1 = arith.constant 0 : i32
    return %arg1, %c0_i32, %c0_i32_0 : i32, i32, i32
  }
  func.func @transform_8(%arg0: i32, %arg1: i32) -> (i32, i32, i32) {
    %c0_i32 = arith.constant 0 : i32
    %c0_i32_0 = arith.constant 0 : i32
    %c0_i32_1 = arith.constant 0 : i32
    return %arg1, %c0_i32, %c0_i32_0 : i32, i32, i32
  }
  func.func @transform_9(%arg0: i32, %arg1: i32) -> (i32, i32) {
    %c0_i32 = arith.constant 0 : i32
    %c0_i32_0 = arith.constant 0 : i32
    %c0_i32_1 = arith.constant 0 : i32
    return %c0_i32, %c0_i32_0 : i32, i32
  }
  func.func @transform_10(%arg0: i32, %arg1: i32) -> (i32, i32) {
    %c0_i32 = arith.constant 0 : i32
    %c0_i32_0 = arith.constant 0 : i32
    %c0_i32_1 = arith.constant 0 : i32
    return %c0_i32, %c0_i32_0 : i32, i32
  }
  func.func @transform_11(%arg0: i32, %arg1: i32) -> (i32, i32) {
    %c0_i32 = arith.constant 0 : i32
    %c0_i32_0 = arith.constant 0 : i32
    %c0_i32_1 = arith.constant 0 : i32
    return %c0_i32, %c0_i32_0 : i32, i32
  }
  func.func @transform_12(%arg0: i32, %arg1: i32) -> (i32, i32) {
    %c0_i32 = arith.constant 0 : i32
    %c0_i32_0 = arith.constant 0 : i32
    %c0_i32_1 = arith.constant 0 : i32
    return %c0_i32, %c0_i32_0 : i32, i32
  }
  func.func @transform_13(%arg0: i32, %arg1: i32) -> (i32, i32, i32) {
    %c0_i32 = arith.constant 0 : i32
    %c0_i32_0 = arith.constant 0 : i32
    %c0_i32_1 = arith.constant 0 : i32
    return %arg0, %c0_i32, %c0_i32_0 : i32, i32, i32
  }
}

</mosaic_0001>

<bundles_post_ra>
// kernel: multitask_forward.1
= control target key start
LH: loop header
LB: loop body
LE: loop exit
PB: predicated region body
PF: predicated region fallthrough
CT: control target
= control target key end

     0   :  { %s2160_s25 = smov 0   ;;  %s2162_s26 = smov 0   ;;  %s2423_s0 = inlined_call_operand.vmem [shape: f32[2,8,32], index: 0, kind: input, shape index: {}]   ;;  %s2424_s1 = inlined_call_operand.vmem [shape: f32[2,1,8], index: 1, kind: input, shape index: {}]   ;;  %s2425_s2 = inlined_call_operand.vmem [shape: f32[1,32], index: 2, kind: input, shape index: {}]   ;;  %s2426_s3 = inlined_call_operand.vmem [shape: f32[1,32], index: 3, kind: input, shape index: {}]   ;;  %s2427_s4 = inlined_call_operand.vmem [shape: bf16[2,32,384], index: 4, kind: input, shape index: {}]   ;;  %s2428_s5 = inlined_call_operand.vmem [shape: bf16[2,32,32], index: 5, kind: input, shape index: {}]   ;;  %s2429_s6 = inlined_call_operand.vmem [shape: bf16[2,32,64], index: 6, kind: input, shape index: {}]   ;;  %s2430_s7 = inlined_call_operand.vmem [shape: bf16[2,64,32], index: 7, kind: input, shape index: {}]   ;;  %s2431_s8 = inlined_call_operand.vmem [shape: f32[2,8,384], index: 8, kind: input, shape index: {}]   ;;  %s2432_s9 = inlined_call_operand.vmem [shape: bf16[32,32], index: 9, kind: input, shape index: {}]   ;;  %s2433_s10 = inlined_call_operand.vmem [shape: f32[1,32], index: 10, kind: input, shape index: {}]   ;;  %s2434_s11 = inlined_call_operand.vmem [shape: bf16[32,128], index: 11, kind: input, shape index: {}]   ;;  %s2435_s12 = inlined_call_operand.vmem [shape: f32[1,128], index: 12, kind: input, shape index: {}]   ;;  %s2436_s13 = inlined_call_operand.vmem [shape: f32[2,1,128], index: 13, kind: output, shape index: {}]  }
   0x1   :  { %2441 = sst [smem:[#allocation8_spill]] %s2423_s0  ;;  %s2164_s27 = smov 0  }
   0x2   :  { %2442 = sst [smem:[#allocation9_spill]] %s2427_s4  ;;  %s2166_s28 = smov 0  }
   0x3   :  { %2443 = sst [smem:[#allocation10_spill]] %s2433_s10  ;;  %s2168_s29 = smov 0  }
   0x4   :  { %2444 = sst [smem:[#allocation11_spill]] %s2434_s11 }
   0x5   :  { %2445 = sst [smem:[#allocation12_spill]] %s2435_s12 }
   0x6 LB: > { %2446 = sst [smem:[#allocation3_spill]] %s2069_s27  ;;  %s32_s30 = sadd.s32 1, %s2069_s27  ;;  %s2077_s29 = sphi %s2168_s29, %s23_s29   ;;  %s2073_s28 = sphi %s2166_s28, %s2461_s28   ;;  %s2069_s27 = sphi %s2164_s27, %s2460_s27   ;;  %s2065_s26 = sphi %s2162_s26, %s2459_s26   ;;  %s2061_s25 = sphi %s2160_s25, %s2458_s25  }
   0x7   : > { %2447 = sst [smem:[#allocation4_spill]] %s2073_s28  ;;  %s35_s14 = sadd.s32 1, %s2073_s28 }
   0x8   : > { %2448 = sst [smem:[#allocation5_spill]] %s2077_s29  ;;  %p33_p0 = scmp.ge.s32.totalorder %s32_s30, 2 }
   0x9   : > { %p1751_p1 = scmp.ge.s32.totalorder %s2077_s29, 1  ;;  %p456_p2 = scmp.lt.s32.totalorder %s2077_s29, 5 }
   0xa   : > { %s2463_s30 = smov (%p33_p0, %s32_s30), 0  ;;  %s2465_s14 = smov (!%p33_p0, %s35_s14), %s2073_s28 }
   0xb   : > { %2449 = sst [smem:[#allocation6_spill]] %s2463_s30  ;;  %p457_p3 = pnand %p1751_p1, %p456_p2 }
   0xc   : > { %p37_p4 = scmp.ge.s32.totalorder %s2465_s14, 2  ;;  %p525_p5 = scmp.lt.s32.totalorder (!%p457_p3), %s2065_s26, 1 }
   0xd   : > { %460 = sbr.rel (%p457_p3) target bundleno = 3303 (0xce7), region = 72  ;;  %p532_p6 = scmp.lt.s32.totalorder (!%p457_p3), %s2061_s25, 1 }
   0xe   : > { %s2467_s14 = smov (%p37_p4, %s2465_s14), 0  ;;  %s2451_s0 = sld [smem:[#allocation8_spill]] (!%p457_p3) }
   0xf   : > { %2450 = sst [smem:[#allocation7_spill]] %s2467_s14  ;;  %s2452_s4 = sld [smem:[#allocation9_spill]] (!%p457_p3) }
  0x10   : > { %p1761_p7 = scmp.ne.s32.totalorder (!%p457_p3), %s2061_s25, 0 }
  0x14   : > { %s2469_s26 = smov (!%p525_p5, %s2065_s26), 1  ;;  %vm568_vm0 = vcmask (!%p1761_p7), 261120   ;;  %v1762_v11 = vld [vmem:[%s2425_s2] ss:$0 sm:$0xff] (!%p1761_p7) }
  0x15   : > { %s533_s15 = scalar_select %p532_p6, %s2061_s25, 1 }
  0x16   : > { %s1752_s16 = sshll.u32 %s2469_s26, 3  ;;  %s559_s30 = scalar_lea.vmem %s2436_s13, %s2469_s26  ;;  %v1763_v13 = vld [vmem:[%s2426_s3] ss:$0 sm:$0xff] (!%p1761_p7) }
  0x17   : > { %s528_s22 = scalar_lea.vmem %s2451_s0, %s1752_s16  ;;  %s1940_s23 = smul.u32 48, %s533_s15 }
  0x18   : > { %s1801_s24 = sshll.u32 %s533_s15, 4  ;;  %s1803_s14 = sshll.u32 %s533_s15, 5  ;;  %v565_v0 = vld [vmem:[%s528_s22] sm:$0xff] (!%p1761_p7) }
  0x19   : > { %s2207_s27 = scalar_lea.vmem %s2452_s4, %s1940_s23  ;;  %s2212_s10 = scalar_lea.vmem %s2428_s5, %s1801_s24  ;;  %v569_v1 = vsel (!%p1761_p7), %vm568_vm0, %v565_v0, 0.0 }
  0x1a   : > { %s2217_s18 = scalar_lea.vmem %s2429_s6, %s1801_s24  ;;  %s2222_s21 = scalar_lea.vmem %s2430_s7, %s1803_s14  ;;  %570 = vadd.xlane.f32.xlu0 (!%p1761_p7), %v569_v1 }
  0x1b   : > { %s1941_s19 = smul.u32 24, %s533_s15 }
  0x1c   : > { %564 = sbr.rel (%p1761_p7) target bundleno = 339 (0x153), region = 76 }
  0x1d   : > { %s2231_s12 = scalar_lea.vmem %s2431_s8, %s1941_s19 }
  0xa7   : > { %v571_v2 = vpop.xlane.xlu0 %570 }
  0xa8   : > { %v573_v3 = vmul.f32 0.03125, %v571_v2 }
  0xaa   : > { %v574_v4 = vsub.f32 %v565_v0, %v573_v3 }
  0xac   : > { %v575_v5 = vmul.f32 %v574_v4, %v574_v4 }
  0xae   : > { %v576_v6 = vsel %vm568_vm0, %v575_v5, 0.0 }
  0xaf   : > { %577 = vadd.xlane.f32.xlu0 %v576_v6 }
 0x13c   : > { %v578_v7 = vpop.xlane.xlu0 %577 }
 0x13d   : > { %v579_v8 = vmul.f32 0.03125, %v578_v7 }
 0x13f   : > { %v580_v9 = vadd.f32 1e-05, %v579_v8 }
 0x141   : > { %1993 = vrsqrt.f32 %v580_v9 }
 0x14b   : > { %v1994_v10 = vpop.eup %1993 }
 0x14c   : > { %v582_v12 = vmul.f32 %v1994_v10, %v574_v4 }
 0x14e   : > { %v589_v14 = vmul.f32 %v1762_v11, %v582_v12 }
 0x150   : > { %v596_v15 = vadd.f32 %v1763_v13, %v589_v14 }
 0x152   : > { %597 = vst.msk [vmem:[#allocation2] sm:$0xff] %vm568_vm0, %v596_v15 }
 0x153 PF: > { %v1995_v16 = vld [vmem:[%s2207_s27 + $0x4] ss:$12 sps:$4 sm:$0xff]   ;;  %v1997_v17 = vld [vmem:[%s2207_s27] ss:$12 sps:$4 sm:$0xff]   ;;  %v2079_v18 = vmov 0   ;;  %vm655_vm1 = vcmask 261120   ;;  %v611_v26 = vlaneseq  ;;  %s2453_s24 = scalar_lea.vmem %s2424_s1, %s2469_s26 }
 0x154   : > { %691 = vmatprep.mubr.bf16.mxu1 %v2079_v18  ;;  %659 = vmatprep.subr.bf16.mxu1 %v1995_v16  ;;  %v1998_v19 = vld [vmem:[%s2207_s27 + $0x1c] ss:$12 sps:$4 sm:$0xff]   ;;  %v2000_v20 = vld [vmem:[%s2207_s27 + $0x18] ss:$12 sps:$4 sm:$0xff]   ;;  %v2080_v23 = vmov 0.0   ;;  %vm2081_vm2 = vmmov 0  }
 0x155   : > { %660 = vmatpush1.bf16.msra.mxu1 %v1997_v17  ;;  %1848 = vmatprep.subr.bf16.mxu0 %v2080_v23  ;;  %v2001_v24 = vld [vmem:[%s2207_s27 + $0x8] ss:$12 sps:$4 sm:$0xff]   ;;  %v2002_v25 = vld [vmem:[%s2207_s27 + $0x20] ss:$12 sps:$4 sm:$0xff]   ;;  %v2265_v27 = vshrl.u32 %v611_v26, 7  ;;  %s2082_s27 = smov 120  }
 0x156   : > { %661 = vmatprep.subr.bf16.mxu1 %v1998_v19  ;;  %1850 = vmatprep.mubr.msk.bf16.mxu0 %vm2081_vm2, %v2080_v23  ;;  %v2269_v29 = vld [vmem:[%s2231_s12] sm:$0xff]  ;;  %v600_v30 = vld [vmem:[%s2231_s12 + $0x8] sm:$0xff]  ;;  %vm789_vm3 = vcmask 64512   ;;  %s2083_s14 = smov 104   ;;  %s2084_s15 = smov 112   ;;  %v601_v46 = vld [vmem:[%s2231_s12 + $0x10] sm:$0xff] }
 0x157   : > { %v613_v28 = vsub.s32 0, %v2265_v27  ;;  %vm1025_vm4 = vcmask 1043456   ;;  %v1772_v2 = vld [vmem:[%s2453_s24] ss:$0 sm:$0xff]  ;;  %s2085_s17 = smov 8   ;;  %s2086_s20 = smov 16  }
 0x158   : > { %s2087_s16 = smov 24   ;;  %vm1220_vm5 = vcmask 130048   ;;  %vm1222_vm6 = vcmask 195584   ;;  %vm1423_vm7 = vcmask 523264   ;;  %p1792_p8 = scmp.ne.s32.totalorder %s2061_s25, 1 }
 0x159   : > { %v2247_v21 = vld [vmem:[#allocation2] sm:$0xff]  ;;  %662 = vmatpush1.bf16.msra.mxu1 %v2000_v20  ;;  %v614_v31 = vrot.slane %v2269_v29, %v613_v28  ;;  %v618_v32 = vrot.slane %v600_v30, %v613_v28  ;;  %v622_v50 = vrot.slane %v601_v46, %v613_v28  ;;  %vm2089_vm8 = vmmov (!%p1792_p8), 0   ;;  %s2454_s12 = sld [smem:[#allocation11_spill]] (!%p1792_p8)  ;;  %s2456_s19 = sld [smem:[#allocation12_spill]] (!%p1792_p8) }
 0x15a   : > { %v602_v22 = vpack.c.bf16 %v2247_v21, %v2247_v21  ;;  %1840 = vmatprep.subr.bf16.mxu1 %v2080_v23 }
 0x15c   : > { %1770 = vmatmul.mubr.msk.bf16.vlgmr.msra.gmra.mrb[0].mxu1 %vm655_vm1, %v602_v22 }
 0x15d   : > { %1844 = vmatprep.mubr.msk.bf16.mxu1 %vm2081_vm2, %v2080_v23  ;;  %1841 = vmatpush3.bf16.msra.mxu1 %v2001_v24 }
 0x15e   : > { %1842 = vmatprep.subr.bf16.mxu1 %v2080_v23 }
 0x161   : > { %1843 = vmatpush3.bf16.msra.mxu1 %v2002_v25 }
 0x162   : > { %1854 = vmatprep.subr.bf16.mxu1 %v2080_v23 }
 0x164   : > { %1845 = vmatmul.mubr.msk.bf16.vlgmr.msra.gmra.mrb[4].mxu1 %vm655_vm1, %v602_v22 }
 0x165   : > { %1856 = vmatprep.mubr.msk.bf16.mxu1 %vm2081_vm2, %v2080_v23 }
 0x22f   : > { %v693_v33 = vpop.f32.mrb[0].mxu1 }
 0x230   : > { %v694_v34 = vadd.f32 %v693_v33, %v614_v31  ;;  %v695_v35 = vpop.f32.mrb[1].mxu1 }
 0x231   : > { %v696_v36 = vadd.f32 %v695_v35, %v618_v32  ;;  %v697_v37 = vpop.f32.mrb[2].mxu1 }
 0x232   : > { %v698_v38 = vpop.f32.mrb[3].mxu1  ;;  %741 = vrot.lane.b32.xlu1 %v694_v34, %s2082_s27  ;;  %v750_v41 = vpack.c.bf16 %v694_v34, %v694_v34 }
 0x233   : > { %755 = vrot.lane.b32.xlu0 %v696_v36, %s2082_s27  ;;  %v764_v39 = vpack.c.bf16 %v696_v36, %v696_v36 }
 0x235   : > { %v794_v40 = vsel %vm789_vm3, %v764_v39, 0 }
 0x236   : > { %1849 = vmatpush3.bf16.xpose.msra.mxu0 %v794_v40  ;;  %761 = vrot.lane.b32.xlu1 %v696_v36, %s2083_s14 }
 0x237   : > { %758 = vrot.lane.b32.xlu0 %v696_v36, %s2084_s15  ;;  %1860 = vmatprep.subr.bf16.mxu0 %v2080_v23  ;;  %v734_v42 = vpop.f32.mrb[4].mxu1 }
 0x238   : > { %v1846_v43 = vpop.f32.mrb[5].mxu1  ;;  %v2287_v55 = vadd.f32 %v734_v42, %v622_v50 }
 0x239   : > { %v737_v44 = vpop.f32.mrb[6].mxu1 }
 0x23a   : > { %747 = vrot.lane.b32.xlu1 %v694_v34, %s2083_s14  ;;  %v1847_v45 = vpop.f32.mrb[7].mxu1  ;;  %v778_v59 = vpack.c.bf16 %v2287_v55, %v2287_v55 }
 0x23b   : > { %744 = vrot.lane.b32.xlu0 %v694_v34, %s2084_s15 }
 0x23c   : > { %v1027_v63 = vsel %vm1025_vm4, %v778_v59, 0 }
 0x23d   : > { %1851 = vmatmul.mubr.msk.bf16.vlgmr.msra.gmra.mrb[0].mxu0 %vm789_vm3, %v750_v41 }
 0x23e   : > { %1862 = vmatprep.mubr.msk.bf16.mxu0 %vm2081_vm2, %v2080_v23 }
 0x2a4   : > { %v742_v47 = vpop.permute.xlu1 %741 }
 0x2a5   : > { %v756_v48 = vpop.permute.xlu0 %755  ;;  %v751_v58 = vpack.c.bf16 %v742_v47, %v742_v47 }
 0x2a6   : > { %v765_v49 = vpack.c.bf16 %v756_v48, %v756_v48 }
 0x2a8   : > { %v840_v51 = vsel %vm789_vm3, %v765_v49, 0  ;;  %v762_v52 = vpop.permute.xlu1 %761 }
 0x2a9   : > { %1855 = vmatpush3.bf16.xpose.msra.mxu1 %v840_v51  ;;  %v759_v53 = vpop.permute.xlu0 %758  ;;  %v767_v56 = vpack.c.bf16 %v762_v52, %v762_v52 }
 0x2aa   : > { %v766_v54 = vpack.c.bf16 %v759_v53, %v759_v53  ;;  %1866 = vmatprep.subr.bf16.mxu1 %v2080_v23 }
 0x2ab   : > { %v932_v61 = vsel %vm789_vm3, %v767_v56, 0 }
 0x2ac   : > { %v886_v57 = vsel %vm789_vm3, %v766_v54, 0  ;;  %v748_v0 = vpop.permute.xlu1 %747 }
 0x2ad   : > { %1861 = vmatpush3.bf16.xpose.msra.mxu0 %v886_v57  ;;  %v745_v60 = vpop.permute.xlu0 %744  ;;  %v753_v1 = vpack.c.bf16 %v748_v0, %v748_v0 }
 0x2ae   : > { %1872 = vmatprep.subr.bf16.mxu0 %v2080_v23  ;;  %v752_v62 = vpack.c.bf16 %v745_v60, %v745_v60 }
 0x2b0   : > { %1857 = vmatmul.mubr.msk.bf16.vlgmr.msra.gmra.mrb[8].mxu1 %vm789_vm3, %v751_v58 }
 0x2b1   : > { %1867 = vmatpush3.bf16.xpose.msra.mxu1 %v932_v61  ;;  %1868 = vmatprep.mubr.msk.bf16.mxu1 %vm2081_vm2, %v2080_v23 }
 0x2b2   : > { %1878 = vmatprep.subr.bf16.mxu1 %v2080_v23 }
 0x2b4   : > { %1863 = vmatmul.mubr.msk.bf16.vlgmr.msra.gmra.mrb[4].mxu0 %vm789_vm3, %v752_v62 }
 0x2b5   : > { %1873 = vmatpush3.bf16.msra.mxu0 %v1027_v63  ;;  %1874 = vmatprep.mubr.msk.bf16.mxu0 %vm2081_vm2, %v2080_v23 }
 0x2b6   : > { %1884 = vmatprep.subr.bf16.mxu0 %v2080_v23 }
 0x2b8   : > { %1869 = vmatmul.mubr.msk.bf16.vlgmr.msra.gmra.mrb[12].mxu1 %vm789_vm3, %v753_v1 }
 0x2b9   : > { %1880 = vmatprep.mubr.msk.bf16.mxu1 %vm2081_vm2, %v2080_v23 }
 0x310   : > { %v830_v3 = vpop.f32.mrb[0].mxu0 }
 0x311   : > { %v831_v4 = vadd.f32 %v1772_v2, %v830_v3  ;;  %v1852_v5 = vpop.f32.mrb[1].mxu0 }
 0x312   : > { %v833_v6 = vpop.f32.mrb[2].mxu0 }
 0x313   : > { %v1853_v7 = vpop.f32.mrb[3].mxu0  ;;  %v974_v8 = vsel %vm789_vm3, %v831_v4, -inf }
 0x314   : > { %975 = vmax.xlane.f32.xlu0 %v974_v8 }
 0x383   : > { %v876_v9 = vpop.f32.mrb[8].mxu1 }
 0x384   : > { %v877_v10 = vadd.f32 %v1772_v2, %v876_v9  ;;  %v1858_v11 = vpop.f32.mrb[9].mxu1 }
 0x385   : > { %v879_v12 = vpop.f32.mrb[10].mxu1 }
 0x386   : > { %v1859_v13 = vpop.f32.mrb[11].mxu1  ;;  %v977_v14 = vsel %vm789_vm3, %v877_v10, -inf }
 0x387   : > { %978 = vmax.xlane.f32.xlu1 %v977_v14  ;;  %v922_v15 = vpop.f32.mrb[4].mxu0 }
 0x388   : > { %v923_v16 = vadd.f32 %v1772_v2, %v922_v15  ;;  %v1864_v17 = vpop.f32.mrb[5].mxu0 }
 0x389   : > { %v925_v18 = vpop.f32.mrb[6].mxu0  ;;  %v2004_v17 = vld [vmem:[%s2212_s10 + $0x8] sm:$0xff]  }
 0x38a   : > { %v1865_v19 = vpop.f32.mrb[7].mxu0  ;;  %v980_v20 = vsel %vm789_vm3, %v923_v16, -inf }
 0x38b   : > { %v968_v22 = vpop.f32.mrb[12].mxu1  ;;  %981 = vmax.xlane.f32.xlu0 %v980_v20 }
 0x38c   : > { %v969_v24 = vadd.f32 %v1772_v2, %v968_v22  ;;  %v1870_v25 = vpop.f32.mrb[13].mxu1 }
 0x38d   : > { %v971_v26 = vpop.f32.mrb[14].mxu1 }
 0x38e   : > { %v1871_v28 = vpop.f32.mrb[15].mxu1  ;;  %v983_v30 = vsel %vm789_vm3, %v969_v24, -inf }
 0x38f   : > { %984 = vmax.xlane.f32.xlu0 %v983_v30 }
 0x398   : > { %769 = vrot.lane.b32.xlu1 %v2287_v55, %s2082_s27  ;;  %s2455_s27 = sld [smem:[#allocation10_spill]] (!%p1792_p8) }
 0x3a1   : > { %v976_v31 = vpop.xlane.xlu0 %975 }
 0x3a2   : > { %v986_v32 = vsub.f32 %v831_v4, %v976_v31 }
 0x3a4   : > { %v990_v33 = vmul.f32 1.442695, %v986_v32 }
 0x3a6   : > { %2011 = vpow2.f32 %v990_v33 }
 0x3b0   : > { %v2012_v34 = vpop.eup %2011 }
 0x3b1   : > { %v998_v35 = vsel %vm789_vm3, %v2012_v34, 0.0 }
 0x3bc   : > { %999 = vadd.xlane.f32.xlu1 %v998_v35 }
 0x414   : > { %v979_v36 = vpop.xlane.xlu1 %978 }
 0x415   : > { %v987_v37 = vsub.f32 %v877_v10, %v979_v36 }
 0x417   : > { %v992_v38 = vmul.f32 1.442695, %v987_v37 }
 0x418   : > { %v770_v39 = vpop.permute.xlu1 %769  ;;  %v982_v40 = vpop.xlane.xlu0 %981 }
 0x419   : > { %2013 = vpow2.f32 %v992_v38  ;;  %v779_v41 = vpack.c.bf16 %v770_v39, %v770_v39  ;;  %v988_v42 = vsub.f32 %v923_v16, %v982_v40  ;;  %v2003_v16 = vld [vmem:[%s2212_s10] sm:$0xff]  }
 0x41b   : > { %v1073_v43 = vsel %vm1025_vm4, %v779_v41, 0  ;;  %v994_v44 = vmul.f32 1.442695, %v988_v42  ;;  %v1231_v41 = vsub.s32 1, %v2265_v27 }
 0x41c   : > { %1879 = vmatpush3.bf16.msra.mxu1 %v1073_v43  ;;  %v985_v45 = vpop.xlane.xlu0 %984 }
 0x41d   : > { %2015 = vpow2.f32 %v994_v44  ;;  %v989_v46 = vsub.f32 %v969_v24, %v985_v45  ;;  %1890 = vmatprep.subr.bf16.mxu1 %v2080_v23  ;;  %v1232_v42 = vrot.slane %v2269_v29, %v1231_v41 }
 0x41f   : > { %v996_v47 = vmul.f32 1.442695, %v989_v46 }
 0x421   : > { %2017 = vpow2.f32 %v996_v47 }
 0x423   : > { %v2014_v48 = vpop.eup %2013 }
 0x424   : > { %v1001_v49 = vsel %vm789_vm3, %v2014_v48, 0.0 }
 0x425   : > { %1002 = vadd.xlane.f32.xlu0 %v1001_v49 }
 0x427   : > { %v2016_v50 = vpop.eup %2015 }
 0x428   : > { %v1004_v51 = vsel %vm789_vm3, %v2016_v50, 0.0 }
 0x429   : > { %1005 = vadd.xlane.f32.xlu1 %v1004_v51 }
 0x42b   : > { %v2018_v52 = vpop.eup %2017 }
 0x42c   : > { %v1007_v53 = vsel %vm789_vm3, %v2018_v52, 0.0 }
 0x42d   : > { %1008 = vadd.xlane.f32.xlu0 %v1007_v53 }
 0x43a   : > { %775 = vrot.lane.b32.xlu1 %v2287_v55, %s2083_s14 }
 0x443   : > { %772 = vrot.lane.b32.xlu0 %v2287_v55, %s2084_s15 }
 0x449   : > { %v1000_v54 = vpop.xlane.xlu1 %999 }
 0x44a   : > { %2019 = vrcp.f32 %v1000_v54 }
 0x454   : > { %v2020_v56 = vpop.eup %2019 }
 0x455   : > { %v1011_v57 = vmul.f32 %v2020_v56, %v2012_v34  ;;  %v2005_v56 = vld [vmem:[%s2217_s18] sm:$0xff]  }
 0x457   : > { %v1018_v58 = vpack.c.bf16 %v1011_v57, %v1011_v57  ;;  %v2006_v57 = vld [vmem:[%s2217_s18 + $0x8] sm:$0xff]  }
 0x459   : > { %1875 = vmatmul.mubr.msk.bf16.vlgmr.msra.gmra.mrb[8].mxu0 %vm789_vm3, %v1018_v58 }
 0x45a   : > { %1886 = vmatprep.mubr.msk.bf16.mxu0 %vm2081_vm2, %v2080_v23 }
 0x4b2   : > { %v1003_v59 = vpop.xlane.xlu0 %1002 }
 0x4b3   : > { %2021 = vrcp.f32 %v1003_v59 }
 0x4b6   : > { %v1006_v60 = vpop.xlane.xlu1 %1005 }
 0x4b7   : > { %2023 = vrcp.f32 %v1006_v60  ;;  %v1305_v60 = vsub.s32 2, %v2265_v27 }
 0x4ba   : > { %v1009_v61 = vpop.xlane.xlu0 %1008  ;;  %v776_v62 = vpop.permute.xlu1 %775 }
 0x4bb   : > { %2025 = vrcp.f32 %v1009_v61  ;;  %v781_v55 = vpack.c.bf16 %v776_v62, %v776_v62  ;;  %v1310_v61 = vsub.s32 3, %v2265_v27  ;;  %v1306_v62 = vrot.slane %v2269_v29, %v1305_v60 }
 0x4bd   : > { %v2022_v63 = vpop.eup %2021  ;;  %v1165_v7 = vsel %vm1025_vm4, %v781_v55, 0  ;;  %v1311_v55 = vrot.slane %v2269_v29, %v1310_v61 }
 0x4be   : > { %v1013_v0 = vmul.f32 %v2022_v63, %v2014_v48  ;;  %v773_v1 = vpop.permute.xlu0 %772 }
 0x4bf   : > { %v780_v2 = vpack.c.bf16 %v773_v1, %v773_v1 }
 0x4c0   : > { %v1019_v3 = vpack.c.bf16 %v1013_v0, %v1013_v0 }
 0x4c1   : > { %v2024_v4 = vpop.eup %2023  ;;  %v1119_v5 = vsel %vm1025_vm4, %v780_v2, 0 }
 0x4c2   : > { %v1015_v6 = vmul.f32 %v2024_v4, %v2016_v50  ;;  %1881 = vmatmul.mubr.msk.bf16.vlgmr.msra.gmra.mrb[16].mxu1 %vm789_vm3, %v1019_v3  ;;  %1885 = vmatpush3.bf16.msra.mxu0 %v1119_v5  ;;  %v2007_v4 = vld [vmem:[%s2222_s21] sm:$0xff]   ;;  %v2008_v5 = vld [vmem:[%s2222_s21 + $0x8] sm:$0xff]  }
 0x4c3   : > { %1891 = vmatpush3.bf16.msra.mxu1 %v1165_v7  ;;  %1892 = vmatprep.mubr.msk.bf16.mxu1 %vm2081_vm2, %v2080_v23  ;;  %v2010_v7 = vld [vmem:[%s2222_s21 + $0x18] sm:$0xff]  }
 0x4c4   : > { %v1020_v8 = vpack.c.bf16 %v1015_v6, %v1015_v6  ;;  %1896 = vmatprep.subr.bf16.mxu0 %v2080_v23  ;;  %1904 = vmatprep.subr.bf16.mxu1 %v2080_v23  ;;  %v2009_v6 = vld [vmem:[%s2222_s21 + $0x10] sm:$0xff]  }
 0x4c5   : > { %v2026_v9 = vpop.eup %2025 }
 0x4c6   : > { %v1017_v10 = vmul.f32 %v2026_v9, %v2018_v52  ;;  %1887 = vmatmul.mubr.msk.bf16.vlgmr.msra.gmra.mrb[12].mxu0 %vm789_vm3, %v1020_v8  ;;  %v1320_v8 = vsub.s32 4, %v2265_v27 }
 0x4c7   : > { %1900 = vmatprep.mubr.msk.bf16.mxu0 %vm2081_vm2, %v2080_v23  ;;  %1897 = vmatpush3.bf16.msra.mxu0 %v2003_v16 }
 0x4c8   : > { %v1021_v11 = vpack.c.bf16 %v1017_v10, %v1017_v10  ;;  %1898 = vmatprep.subr.bf16.mxu0 %v2080_v23  ;;  %v1321_v9 = vrot.slane %v2269_v29, %v1320_v8 }
 0x4ca   : > { %1893 = vmatmul.mubr.msk.bf16.vlgmr.msra.gmra.mrb[20].mxu1 %vm789_vm3, %v1021_v11 }
 0x4cb   : > { %1908 = vmatprep.mubr.msk.bf16.mxu1 %vm2081_vm2, %v2080_v23  ;;  %1899 = vmatpush3.bf16.msra.mxu0 %v2004_v17 }
 0x4cc   : > { %1912 = vmatprep.subr.bf16.mxu0 %v2080_v23  ;;  %1905 = vmatpush3.bf16.msra.mxu1 %v2005_v56  ;;  %v2035_v56 = vld [vmem:[%s2454_s12] sm:$0xff] (!%p1792_p8)  }
 0x4cd   : > { %1906 = vmatprep.subr.bf16.mxu1 %v2080_v23 }
 0x4d0   : > { %1907 = vmatpush3.bf16.msra.mxu1 %v2006_v57  ;;  %v2036_v57 = vld [vmem:[%s2454_s12 + $0x8] sm:$0xff] (!%p1792_p8)  }
 0x52c   : > { %v1063_v12 = vpop.f32.mrb[8].mxu0 }
 0x52d   : > { %v1876_v13 = vpop.f32.mrb[9].mxu0 }
 0x52e   : > { %v1066_v14 = vpop.f32.mrb[10].mxu0 }
 0x52f   : > { %v1877_v15 = vpop.f32.mrb[11].mxu0 }
 0x595   : > { %v1109_v18 = vpop.f32.mrb[16].mxu1 }
 0x596   : > { %1208 = vrot.lane.b32.xlu1 %v1109_v18, %s2085_s17  ;;  %v1882_v19 = vpop.f32.mrb[17].mxu1 }
 0x597   : > { %v1112_v20 = vpop.f32.mrb[18].mxu1 }
 0x598   : > { %v1883_v22 = vpop.f32.mrb[19].mxu1 }
 0x599   : > { %v1155_v24 = vpop.f32.mrb[12].mxu0 }
 0x59a   : > { %1212 = vrot.lane.b32.xlu0 %v1155_v24, %s2086_s20  ;;  %v1888_v25 = vpop.f32.mrb[13].mxu0 }
 0x59b   : > { %v1158_v26 = vpop.f32.mrb[14].mxu0 }
 0x59c   : > { %v1889_v28 = vpop.f32.mrb[15].mxu0  ;;  %v1397_v26 = vsub.s32 5, %v2265_v27 }
 0x59d   : > { %v1201_v30 = vpop.f32.mrb[20].mxu1 }
 0x59e   : > { %1216 = vrot.lane.b32.xlu1 %v1201_v30, %s2087_s16  ;;  %v1894_v31 = vpop.f32.mrb[21].mxu1  ;;  %v1398_v28 = vrot.slane %v2269_v29, %v1397_v26 }
 0x59f   : > { %v1204_v32 = vpop.f32.mrb[22].mxu1 }
 0x5a0   : > { %v1895_v33 = vpop.f32.mrb[23].mxu1 }
 0x608   : > { %v1209_v34 = vpop.permute.xlu1 %1208 }
 0x609   : > { %v1219_v36 = vsel %vm789_vm3, %v1063_v12, %v1209_v34 }
 0x60c   : > { %v1213_v35 = vpop.permute.xlu0 %1212 }
 0x60d   : > { %v1221_v37 = vsel %vm1220_vm5, %v1219_v36, %v1213_v35 }
 0x610   : > { %v1217_v38 = vpop.permute.xlu1 %1216 }
 0x611   : > { %v1223_v39 = vsel %vm1222_vm6, %v1221_v37, %v1217_v38 }
 0x612   : > { %v1224_v40 = vpack.c.bf16 %v1223_v39, %v1223_v39 }
 0x614   : > { %1901 = vmatmul.mubr.msk.bf16.vlgmr.msra.gmra.mrb[16].mxu0 %vm655_vm1, %v1224_v40 }
 0x615   : > { %1920 = vmatprep.mubr.msk.bf16.mxu0 %vm2081_vm2, %v2080_v23  ;;  %1913 = vmatpush3.bf16.msra.mxu0 %v2007_v4 }
 0x616   : > { %1914 = vmatprep.subr.bf16.mxu0 %v2080_v23 }
 0x619   : > { %1915 = vmatpush3.bf16.msra.mxu0 %v2008_v5 }
 0x61a   : > { %1916 = vmatprep.subr.bf16.mxu0 %v2080_v23 }
 0x61d   : > { %1917 = vmatpush3.bf16.msra.mxu0 %v2009_v6 }
 0x61e   : > { %1918 = vmatprep.subr.bf16.mxu0 %v2080_v23 }
 0x621   : > { %1919 = vmatpush3.bf16.msra.mxu0 %v2010_v7 }
 0x6e7   : > { %v1282_v43 = vpop.f32.mrb[16].mxu0 }
 0x6e8   : > { %v1283_v44 = vadd.f32 %v1282_v43, %v1232_v42  ;;  %v1902_v45 = vpop.f32.mrb[17].mxu0 }
 0x6e9   : > { %v1285_v46 = vpop.f32.mrb[18].mxu0  ;;  %v1483_v45 = vsub.s32 6, %v2265_v27 }
 0x6ea   : > { %v1903_v47 = vpop.f32.mrb[19].mxu0  ;;  %v1288_v48 = vadd.f32 %v1283_v44, %v2247_v21  ;;  %v1488_v46 = vsub.s32 7, %v2265_v27  ;;  %v2034_v27 = vld [vmem:[%s2432_s9 + $0x8] sm:$0xff] (!%p1792_p8)  }
 0x6eb   : > { %v1484_v47 = vrot.slane %v2269_v29, %v1483_v45 }
 0x6ec   : > { %v1289_v49 = vsel %vm655_vm1, %v1288_v48, 0.0 }
 0x6ed   : > { %1290 = vadd.xlane.f32.xlu0 %v1289_v49  ;;  %v1489_v49 = vrot.slane %v2269_v29, %v1488_v46 }
 0x77a   : > { %v1291_v50 = vpop.xlane.xlu0 %1290 }
 0x77b   : > { %v1293_v51 = vmul.f32 0.03125, %v1291_v50 }
 0x77d   : > { %v1294_v52 = vsub.f32 %v1288_v48, %v1293_v51 }
 0x77f   : > { %v1295_v53 = vmul.f32 %v1294_v52, %v1294_v52 }
 0x781   : > { %v1296_v54 = vsel %vm655_vm1, %v1295_v53, 0.0  ;;  %v2033_v53 = vld [vmem:[%s2432_s9] sm:$0xff] (!%p1792_p8)  }
 0x782   : > { %1297 = vadd.xlane.f32.xlu1 %v1296_v54  ;;  %v2088_v54 = vmov (!%p1792_p8), 0.0  }
 0x783   : > { %1924 = vmatprep.subr.bf16.mxu0 (!%p1792_p8), %v2088_v54  ;;  %1932 = vmatprep.subr.bf16.mxu1 (!%p1792_p8), %v2088_v54 }
 0x80f   : > { %v1298_v58 = vpop.xlane.xlu1 %1297 }
 0x810   : > { %v1299_v59 = vmul.f32 0.03125, %v1298_v58  ;;  %v1501_v58 = vld [vmem:[%s2455_s27] sm:$0x1] (!%p1792_p8) }
 0x812   : > { %v1300_v21 = vadd.f32 1e-05, %v1299_v59 }
 0x814   : > { %2027 = vrsqrt.f32 %v1300_v21 }
 0x81e   : > { %v2028_v63 = vpop.eup %2027 }
 0x81f   : > { %v1302_v0 = vmul.f32 %v2028_v63, %v1294_v52 }
 0x821   : > { %v1307_v1 = vmul.f32 %v1306_v62, %v1302_v0 }
 0x823   : > { %v1312_v2 = vadd.f32 %v1311_v55, %v1307_v1  ;;  %v1563_v55 = vld [vmem:[%s2456_s19] sm:$0x1] (!%p1792_p8) }
 0x825   : > { %v1313_v3 = vpack.c.bf16 %v1312_v2, %v1312_v2 }
 0x827   : > { %1909 = vmatmul.mubr.msk.bf16.vlgmr.msra.gmra.mrb[24].mxu1 %vm655_vm1, %v1313_v3 }
 0x828   : > { %1936 = vmatprep.mubr.msk.bf16.mxu1 (!%p1792_p8), %vm2089_vm8, %v2088_v54  ;;  %1933 = vmatpush3.bf16.msra.mxu1 (!%p1792_p8), %v2035_v56 }
 0x829   : > { %1934 = vmatprep.subr.bf16.mxu1 (!%p1792_p8), %v2088_v54 }
 0x82c   : > { %1935 = vmatpush3.bf16.msra.mxu1 (!%p1792_p8), %v2036_v57 }
 0x8fa   : > { %v1371_v10 = vpop.f32.mrb[24].mxu1 }
 0x8fb   : > { %v1372_v11 = vadd.f32 %v1371_v10, %v1321_v9  ;;  %v1910_v12 = vpop.f32.mrb[25].mxu1 }
 0x8fc   : > { %v1374_v13 = vpop.f32.mrb[26].mxu1 }
 0x8fd   : > { %v1377_v14 = vmul.f32 %v1372_v11, %v1372_v11  ;;  %v1911_v15 = vpop.f32.mrb[27].mxu1 }
 0x8ff   : > { %v1378_v16 = vmul.f32 %v1377_v14, %v1372_v11 }
 0x901   : > { %v1379_v17 = vmul.f32 0.044715, %v1378_v16 }
 0x903   : > { %v1380_v18 = vadd.f32 %v1379_v17, %v1372_v11 }
 0x905   : > { %v1381_v19 = vmul.f32 0.7978846, %v1380_v18 }
 0x907   : > { %2029 = vtanh.f32 %v1381_v19 }
 0x911   : > { %v2030_v20 = vpop.eup %2029 }
 0x912   : > { %v1383_v22 = vadd.f32 1.0, %v2030_v20 }
 0x914   : > { %v1384_v23 = vmul.f32 0.5, %v1383_v22 }
 0x916   : > { %v1385_v24 = vmul.f32 %v1384_v23, %v1372_v11 }
 0x918   : > { %v1386_v25 = vpack.c.bf16 %v1385_v24, %v1385_v24 }
 0x91a   : > { %1921 = vmatmul.mubr.msk.bf16.vlgmr.msra.gmra.mrb[20].mxu0 %vm1423_vm7, %v1386_v25 }
 0x91b   : > { %1925 = vmatpush3.bf16.msra.mxu0 (!%p1792_p8), %v2033_v53  ;;  %1928 = vmatprep.mubr.msk.bf16.mxu0 (!%p1792_p8), %vm2089_vm8, %v2088_v54 }
 0x91c   : > { %1926 = vmatprep.subr.bf16.mxu0 (!%p1792_p8), %v2088_v54 }
 0x91f   : > { %1927 = vmatpush3.bf16.msra.mxu0 (!%p1792_p8), %v2034_v27 }
 0x9ed   : > { %v1461_v30 = vpop.f32.mrb[20].mxu0 }
 0x9ee   : > { %v1462_v31 = vadd.f32 %v1461_v30, %v1398_v28  ;;  %v1922_v32 = vpop.f32.mrb[21].mxu0 }
 0x9ef   : > { %v1464_v33 = vpop.f32.mrb[22].mxu0 }
 0x9f0   : > { %v1923_v34 = vpop.f32.mrb[23].mxu0  ;;  %v1467_v35 = vadd.f32 %v1462_v31, %v1312_v2 }
 0x9f2   : > { %v1468_v36 = vsel %vm655_vm1, %v1467_v35, 0.0 }
 0x9f3   : > { %1469 = vadd.xlane.f32.xlu0 %v1468_v36 }
 0xa80   : > { %v1470_v37 = vpop.xlane.xlu0 %1469 }
 0xa81   : > { %v1471_v38 = vmul.f32 0.03125, %v1470_v37 }
 0xa83   : > { %v1472_v39 = vsub.f32 %v1467_v35, %v1471_v38 }
 0xa85   : > { %v1473_v40 = vmul.f32 %v1472_v39, %v1472_v39 }
 0xa87   : > { %v1474_v41 = vsel %vm655_vm1, %v1473_v40, 0.0 }
 0xa88   : > { %1475 = vadd.xlane.f32.xlu0 %v1474_v41 }
 0xb15   : > { %v1476_v42 = vpop.xlane.xlu0 %1475 }
 0xb16   : > { %v1477_v43 = vmul.f32 0.03125, %v1476_v42 }
 0xb18   : > { %v1478_v44 = vadd.f32 1e-05, %v1477_v43 }
 0xb1a   : > { %2031 = vrsqrt.f32 %v1478_v44 }
 0xb24   : > { %v2032_v48 = vpop.eup %2031 }
 0xb25   : > { %v1480_v50 = vmul.f32 %v2032_v48, %v1472_v39  ;;  %1495 = sbr.rel (%p1792_p8) target bundleno = 3303 (0xce7), region = 80 }
 0xb27   : > { %v1485_v51 = vmul.f32 %v1484_v47, %v1480_v50 }
 0xb29   : > { %v1490_v52 = vadd.f32 %v1489_v49, %v1485_v51 }
 0xb2b   : > { %1491 = vst.msk [vmem:[#allocation2] sm:$0xff] %vm655_vm1, %v1490_v52  ;;  %v1496_v29 = vpack.c.bf16 (!%p1792_p8), %v1490_v52, %v1490_v52 }
 0xb2d   : > { %1929 = vmatmul.mubr.msk.bf16.vlgmr.msra.gmra.mrb[0].mxu0 %vm655_vm1, %v1496_v29 }
 0xc00   : > { %v1551_v59 = vpop.f32.mrb[0].mxu0 }
 0xc01   : > { %v1552_v21 = vadd.f32 %v1551_v59, %v1501_v58  ;;  %v1930_v60 = vpop.f32.mrb[1].mxu0 }
 0xc02   : > { %v1554_v61 = vpop.f32.mrb[2].mxu0 }
 0xc03   : > { %2037 = vtanh.f32 %v1552_v21  ;;  %v1931_v62 = vpop.f32.mrb[3].mxu0 }
 0xc0d   : > { %v2038_v63 = vpop.eup %2037 }
 0xc0e   : > { %v1558_v0 = vpack.c.bf16 %v2038_v63, %v2038_v63 }
 0xc10   : > { %1937 = vmatmul.mubr.msk.bf16.vlgmr.msra.gmra.mrb[0].mxu1 %vm655_vm1, %v1558_v0 }
 0xce3   : > { %v1613_v1 = vpop.f32.mrb[0].mxu1 }
 0xce4   : > { %v1614_v2 = vadd.f32 %v1613_v1, %v1563_v55  ;;  %v1938_v3 = vpop.f32.mrb[1].mxu1 }
 0xce5   : > { %v1616_v4 = vpop.f32.mrb[2].mxu1 }
 0xce6   : > { %1619 = vst [vmem:[%s559_s30] sm:$0x1] %v1614_v2  ;;  %v1939_v5 = vpop.f32.mrb[3].mxu1 }
 0xce7 PF: > { %s2457_s17 = sld [smem:[#allocation5_spill]]  ;;  %s2458_s25 = sld [smem:[#allocation3_spill]] }
 0xce8   : > { %s2459_s26 = sld [smem:[#allocation4_spill]]  ;;  %s2460_s27 = sld [smem:[#allocation6_spill]] }
 0xce9   : > { %s2461_s28 = sld [smem:[#allocation7_spill]] }
 0xced   : > { %s23_s29 = sadd.s32 1, %s2457_s17  }
 0xcee   : > { %p20_p9 = scmp.ge.s32.totalorder %s23_s29, 6  }
 0xcf0   :  { %22 = sbr.rel (!%p20_p9) target bundleno = 6 (0x6), region = 128 }

</bundles_post_ra>
